<compile_context>
chip_gen: v7x
topology: tpu7x:2x2x1
jax: 0.10.0
libtpu: 0.0.40
codegen_flags: <defaults>
</compile_context>

<pallas_src>
import functools

import jax
import jax.numpy as jnp
from jax import lax
from jax.experimental import pallas as pl
from jax.experimental.pallas import tpu as pltpu

_LANE = 128


def _round_up(x, m):
    return ((x + m - 1) // m) * m


def _sublanes(dtype):
    # Sub-32-bit dtypes pack along sublanes: 8 rows (f32), 16 (bf16), 32 (i8).
    itemsize = jnp.dtype(dtype).itemsize
    return max(8, 8 * (4 // itemsize))


def _choose_spatial_tile(hw, c, dtype, n, max_block_bytes=4 << 20):
    """Pick the lane-tile T (multiple of 128) for the flattened spatial axis."""
    if hw < _LANE:
        # Block equals the full (tiny) spatial dim; only this path uses masked
        # stores, and only for very small feature maps (e.g. 4x4).
        return hw
    itemsize = jnp.dtype(dtype).itemsize
    padded_c = _round_up(c, _sublanes(dtype))          # real VMEM rows per block
    bytes_per_lane_col = padded_c * itemsize
    max_lanes = max(_LANE, (max_block_bytes // bytes_per_lane_col) // _LANE * _LANE)
    t = min(max_lanes, _round_up(hw, _LANE))
    # Keep enough blocks to feed both TensorCores on v7x (harmless elsewhere).
    while t > _LANE and n * ((hw + t - 1) // t) < 4:
        t = max(_LANE, (t // 2) // _LANE * _LANE)
    return t


def _pixelnorm_kernel(x_ref, o_ref, *, inv_c, epsilon):
    # x_ref / o_ref: (C, T) VMEM tiles; normalize each lane over channels.
    xf = x_ref[...].astype(jnp.float32)
    sum_sq = jnp.sum(xf * xf, axis=0, keepdims=True)                     # (1, T) f32
    inv = lax.rsqrt(sum_sq * jnp.float32(inv_c) + jnp.float32(epsilon))  # EUP rsqrt
    o_ref[...] = (xf * inv).astype(o_ref.dtype)                          # f32 mul, one cast


def pixel_norm(x, epsilon=1e-8):
    """x: (N, C, H, W) -> same shape, same dtype. Matches PyTorch PixelNormLayer."""
    N, C, H, W = x.shape
    hw = H * W
    x3 = x.reshape(N, C, hw)  # contiguous reshape: no copy

    T = _choose_spatial_tile(hw, C, x.dtype, N)
    grid = (N, (hw + T - 1) // T)

    itemsize = jnp.dtype(x.dtype).itemsize
    block_bytes = _round_up(C, _sublanes(x.dtype)) * T * itemsize
    # 2x(in) + 2x(out) double-buffered blocks plus slack; stays under v7x's
    # 64 MiB physical VMEM and lifts v5e's 16 MiB scoped default when needed.
    vmem_limit = int(min(48 << 20, max(16 << 20, 6 * block_bytes)))

    kernel = functools.partial(_pixelnorm_kernel, inv_c=1.0 / C, epsilon=epsilon)
    out = pl.pallas_call(
        kernel,
        out_shape=jax.ShapeDtypeStruct((N, C, hw), x.dtype),
        grid_spec=pltpu.PrefetchScalarGridSpec(
            num_scalar_prefetch=0,
            grid=grid,
            in_specs=[pl.BlockSpec((pl.Squeezed(), C, T), lambda n, s: (n, 0, s))],
            out_specs=pl.BlockSpec((pl.Squeezed(), C, T), lambda n, s: (n, 0, s)),
        ),
        compiler_params=pltpu.CompilerParams(
            dimension_semantics=("parallel", "parallel"),
            vmem_limit_bytes=vmem_limit,
        ),
    )(x3)

    return out.reshape(N, C, H, W)


def pixel_norm_ref(x, epsilon=1e-8):
    xf = x.astype(jnp.float32)
    inv = 1.0 / jnp.sqrt(jnp.mean(xf * xf, axis=1, keepdims=True) + epsilon)
    return (xf * inv).astype(x.dtype)


if __name__ == "__main__":
    key = jax.random.PRNGKey(0)

    # Primary check: spec-sized input (hw = 256, tiles shrink for TC balance).
    N, C, H, W = 2, 4, 16, 16
    x = jax.random.normal(key, (N, C, H, W), dtype=jnp.float32)
    out = jax.block_until_ready(pixel_norm(x))
    ref = pixel_norm_ref(x)
    assert out.shape == (N, C, H, W)
    assert out.dtype == x.dtype
    assert jnp.allclose(out, ref, atol=1e-5, rtol=1e-5)

    # Ragged-tail check: hw = 400 is not a multiple of the tile (no pad/slice).
    x2 = jax.random.normal(jax.random.PRNGKey(1), (2, 8, 20, 20), dtype=jnp.float32)
    out2 = jax.block_until_ready(pixel_norm(x2))
    assert jnp.allclose(out2, pixel_norm_ref(x2), atol=1e-5, rtol=1e-5)

    # Tiny spatial check: hw = 16 < 128 (block equals full spatial dim).
    x3 = jax.random.normal(jax.random.PRNGKey(2), (2, 4, 4, 4), dtype=jnp.float32)
    out3 = jax.block_until_ready(pixel_norm(x3))
    assert jnp.allclose(out3, pixel_norm_ref(x3), atol=1e-5, rtol=1e-5)

    print("KERNEL_OK")
</pallas_src>

<mosaic_0001>
module attributes {stable_mosaic.version = 11 : i64} {
  func.func @_pixelnorm_kernel(%arg0: i32, %arg1: i32, %arg2: memref<1x4x128xf32, #tpu.memory_space<vmem>>, %arg3: memref<1x4x128xf32, #tpu.memory_space<vmem>>) attributes {dimension_semantics = [#tpu.dimension_semantics<parallel>, #tpu.dimension_semantics<parallel>], iteration_bounds = array<i64: 2, 2>, scalar_prefetch = 0 : i64, scratch_operands = 0 : i64, tpu.core_type = #tpu.core_type<tc>, window_params = [{transform_indices = @transform_0, window_bounds = array<i64: 1, 4, 128>}, {transform_indices = @transform_1, window_bounds = array<i64: 1, 4, 128>}]} {
    %c0 = arith.constant 0 : index
    %c0_0 = arith.constant 0 : index
    %c0_1 = arith.constant 0 : index
    %0 = vector.load %arg2[%c0, %c0_0, %c0_1] : memref<1x4x128xf32, #tpu.memory_space<vmem>>, vector<1x4x128xf32>
    %1 = vector.shape_cast %0 : vector<1x4x128xf32> to vector<4x128xf32>
    %2 = arith.mulf %1, %1 : vector<4x128xf32>
    %cst = arith.constant dense<0.000000e+00> : vector<128xf32>
    %3 = vector.multi_reduction <add>, %2, %cst [0] : vector<4x128xf32> to vector<128xf32>
    %4 = vector.shape_cast %3 : vector<128xf32> to vector<1x128xf32>
    %cst_2 = arith.constant 2.500000e-01 : f32
    %5 = vector.broadcast %cst_2 : f32 to vector<1x128xf32>
    %6 = arith.mulf %4, %5 : vector<1x128xf32>
    %cst_3 = arith.constant 9.99999993E-9 : f32
    %7 = vector.broadcast %cst_3 : f32 to vector<1x128xf32>
    %8 = arith.addf %6, %7 : vector<1x128xf32>
    %9 = math.rsqrt %8 : vector<1x128xf32>
    %10 = vector.broadcast %9 : vector<1x128xf32> to vector<4x128xf32>
    %11 = arith.mulf %1, %10 : vector<4x128xf32>
    %c0_4 = arith.constant 0 : index
    %c0_5 = arith.constant 0 : index
    %c0_6 = arith.constant 0 : index
    %12 = vector.load %arg3[%c0_4, %c0_5, %c0_6] : memref<1x4x128xf32, #tpu.memory_space<vmem>>, vector<1x4x128xf32>
    %13 = vector.shape_cast %12 : vector<1x4x128xf32> to vector<4x128xf32>
    %14 = vector.shape_cast %11 : vector<4x128xf32> to vector<1x4x128xf32>
    tpu.vector_store %arg3[%c0_4, %c0_5, %c0_6], %14 {strides = array<i32>} : memref<1x4x128xf32, #tpu.memory_space<vmem>>, vector<1x4x128xf32>,
    return
  }
  func.func @transform_0(%arg0: i32, %arg1: i32) -> (i32, i32, i32) {
    %c0_i32 = arith.constant 0 : i32
    %c0_i32_0 = arith.constant 0 : i32
    return %arg0, %c0_i32, %arg1 : i32, i32, i32
  }
  func.func @transform_1(%arg0: i32, %arg1: i32) -> (i32, i32, i32) {
    %c0_i32 = arith.constant 0 : i32
    %c0_i32_0 = arith.constant 0 : i32
    return %arg0, %c0_i32, %arg1 : i32, i32, i32
  }
}

</mosaic_0001>

<bundles_post_ra>
// kernel: tpu_custom_call.1
= control target key start
LH: loop header
LB: loop body
LE: loop exit
PB: predicated region body
PF: predicated region fallthrough
CT: control target
= control target key end

     0   :  { %6 = vsyncpa [#allocation3], 0  ;;  %s697_s0 = inlined_call_operand.hbm [shape: f32[2,4,256], index: 0, kind: input, shape index: {}]   ;;  %s698_s1 = inlined_call_operand.hbm [shape: f32[2,4,256], index: 1, kind: output, shape index: {}]  }
   0x1   :  { %8 = vsyncpa [#allocation3 + $0x1], 0 }
   0x2   :  { %9 = vsyncpa [#allocation4], 0 }
   0x3   :  { %11 = vsyncpa [#allocation4 + $0x1], 0  ;;  %s503_s6 = smov 0   ;;  %s505_s7 = smov 0  }
   0x4   :  { %s507_s8 = smov 0   ;;  %s509_s9 = smov 0  }
   0x5   :  { %s511_s10 = smov 0   ;;  %s513_s11 = smov 0  }
   0x6   :  { %s515_s12 = smov 0   ;;  %s517_s13 = smov 0  }
   0x7 LB: > { %s266_s14 = sadd.s32 4294967295, %s489_s13   ;;  %s267_s15 = sadd.s32 4294967294, %s489_s13   ;;  %s489_s13 = sphi %s517_s13, %s17_s13   ;;  %s485_s12 = sphi %s515_s12, %s715_s12   ;;  %s481_s11 = sphi %s513_s11, %s714_s11   ;;  %s477_s10 = sphi %s511_s10, %s713_s10   ;;  %s473_s9 = sphi %s509_s9, %s712_s9   ;;  %s469_s8 = sphi %s507_s8, %s711_s8   ;;  %s465_s7 = sphi %s505_s7, %s710_s7   ;;  %s461_s6 = sphi %s503_s6, %s709_s6  }
   0x8   : > { %s26_s16 = sadd.s32 1, %s481_s11  ;;  %s29_s17 = sadd.s32 1, %s485_s12 }
   0x9   : > { %p27_p0 = scmp.ge.s32.totalorder %s26_s16, 2  ;;  %s38_s18 = sadd.s32 1, %s469_s8 }
   0xa   : > { %p45_p1 = scmp.ne.s32.totalorder %s469_s8, %s465_s7  ;;  %p46_p2 = scmp.eq.s32.totalorder %s489_s13, 0 }
   0xb   : > { %s717_s16 = smov (%p27_p0, %s26_s16), 0  ;;  %s719_s17 = smov (!%p27_p0, %s29_s17), %s485_s12 }
   0xc   : > { %s34_s19 = ssub.s32 %s481_s11, %s717_s16  ;;  %p556_p3 = por %p46_p2, %p45_p1 }
   0xd   : > { %p31_p4 = scmp.ge.s32.totalorder %s719_s17, 2  ;;  %p51_p5 = scmp.ne.s32.totalorder %s465_s7, %s461_s6 }
   0xe   : > { %p52_p6 = scmp.eq.s32.totalorder %s266_s14, 0  ;;  %p77_p7 = scmp.eq.s32.totalorder %s266_s14, 3 }
   0xf   : > { %s721_s17 = smov (%p31_p4, %s719_s17), 0  ;;  %p83_p10 = scmp.eq.s32.totalorder %s267_s15, 3 }
  0x10   : > { %p564_p8 = por %p52_p6, %p51_p5  ;;  %p568_p9 = por %p77_p7, %p45_p1 }
  0x11   : > { %s33_s23 = ssub.s32 %s485_s12, %s721_s17  ;;  %p574_p12 = por %p83_p10, %p51_p5 }
  0x12   : > { %s702_s22 = scalar_select %p568_p9, 1, 0 }
  0x13   : > { %s35_s24 = sor.u32 %s34_s19, %s33_s23  ;;  %p293_p13 = scmp.lt.s32.totalorder %s489_s13, 4 }
  0x14   : > { %p36_p11 = scmp.eq.s32.totalorder %s35_s24, 0  ;;  %s103_s26 = sand.u32 1, %s469_s8  }
  0x15   : > { %s703_s25 = scalar_select %p574_p12, 1, 0 }
  0x16   : > { %s581_s27 = scalar_select %p36_p11, %s469_s8, %s38_s18  }
  0x17   : > { %s270_s28 = sshll.u32 %s103_s26, 2  ;;  %s271_s29 = sshll.u32 %s485_s12, 1 }
  0x18   : > { %s112_s30 = sadd.s32 %s481_s11, %s271_s29  ;;  %s107_s2 = scalar_lea.vmem [#allocation2], %s270_s28 }
  0x19   : > { %s116_s3 = sshll.u32 %s107_s2, 4  ;;  %s272_s4 = sshll.u32 %s112_s30, 6  ;;  %s585_s3 = int_to_ptr.vmem [resolvable:$true] %s116_s3 }
  0x1a   : > { %s590_s15 = scalar_lea.hbm %s697_s0, %s272_s4  ;;  %p594_p0 = pnand %p293_p13, %p556_p3 }
  0x1b   : > { %s104_s19 = scalar_lea.sflag [#allocation3], %s103_s26  ;;  %s361_s23 = scalar_lea.hbm %s590_s15, 64 }
  0x1c   : > { %p362_p4 = scmp.ne.s32.totalorder %s590_s15, %s361_s23  ;;  %p363_p5 = pneg %p594_p0 }
  0x1d   : > { %s366_s28 = scalar_lea.hbm %s697_s0, 256  ;;  %p367_p3 = scmp.lt.u32.totalorder %s590_s15, %s697_s0 }
  0x1e   : > { %p364_p6 = pnand %p363_p5, %p362_p4  ;;  %p368_p10 = scmp.lt.u32.totalorder %s366_s28, %s361_s23 }
  0x1f   : > { %p370_p13 = scmp.lt.u32.totalorder %s361_s23, %s590_s15 }
  0x20   : > { %p365_p7 = pneg %p364_p6  ;;  %p369_p11 = por %p368_p10, %p367_p3 }
  0x22   : > { %p371_p1 = por %p370_p13, %p369_p11 }
  0x24   : > { %p372_p2 = pnand %p371_p1, %p365_p7 }
  0x26   : > { %375 = shalt.err (!%p372_p2)
}
  0x27   : > { %s376_s26 = scalar_lea.vmem %s585_s3, 64  ;;  %s491_s2 = smov [#allocation2]  }
  0x28   : > { %p377_p4 = scmp.ne.s32.totalorder %s585_s3, %s376_s26  ;;  %s381_s4 = sshll.u32 %s491_s2, 4  ;;  %s382_s4 = int_to_ptr.vmem [resolvable:$false] %s381_s4 }
  0x29   : > { %s383_s5 = scalar_lea.vmem %s382_s4, 128  ;;  %p384_p9 = scmp.lt.s32.totalorder %s585_s3, %s382_s4 }
  0x2a   : > { %p379_p6 = pnand %p377_p4, %p363_p5  ;;  %p385_p3 = scmp.lt.s32.totalorder %s383_s5, %s376_s26 }
  0x2c   : > { %p380_p12 = pneg %p379_p6  ;;  %p386_p10 = por %p385_p3, %p384_p9 }
  0x2e   : > { %p387_p11 = pnand %p386_p10, %p380_p12 }
  0x30   : > { %390 = shalt.err (!%p387_p11)
}
  0x31   : > { %288 = dma.hbm_to_vmem [thread:$0]  (!%p594_p0), %s590_s15, 64, %s585_s3, %s104_s19  }
  0x32   : > { %p705_p1 = scmp.lt.s32.totalorder %s489_s13, 5  ;;  %p706_p2 = scmp.ge.s32.totalorder %s489_s13, 1 }
  0x34   : > { %p122_p5 = pnand %p706_p2, %p705_p1 }
  0x35   : > { %s630_s14 = sand.u32 (!%p122_p5), 1, %s465_s7  }
  0x36   : > { %125 = sbr.rel (%p122_p5) target bundleno = 109 (0x6d), region = 24  ;;  %s274_s23 = sshll.u32 (!%p122_p5), %s630_s14, 2 }
  0x37   : > { %s128_s20 = scalar_lea.sflag (!%p122_p5), [#allocation3], %s630_s14  ;;  %s131_s24 = scalar_lea.vmem (!%p122_p5), [#allocation2], %s274_s23 }
  0x3d   : > { %452 = dma.done.wait (%p564_p8), %s128_s20, 64  }
  0x3e   : > { %454 = vsyncadd (%p564_p8), %s128_s20, 4294967232  ;;  %v150_v0 = vld [vmem:[%s131_s24] sm:$0xf]  ;;  %vm152_vm0 = vcmask 1043456   ;;  %s277_s3 = sshll.u32 %s477_s10, 1  ;;  %s149_s15 = scalar_lea.vmem [#allocation5], %s274_s23 }
  0x3f   : > { %v151_v1 = vmul.f32 %v150_v0, %v150_v0  ;;  %s177_s21 = sadd.s32 %s473_s9, %s277_s3  ;;  %s181_s18 = sshll.u32 %s149_s15, 4  ;;  %s640_s18 = int_to_ptr.vmem [resolvable:$true] %s181_s18 }
  0x40   : > { %s278_s19 = sshll.u32 %s177_s21, 6  ;;  %s166_s26 = scalar_lea.sflag [#allocation4], %s630_s14 }
  0x41   : > { %v153_v2 = vsel %vm152_vm0, %v151_v1, 0.0  ;;  %s645_s30 = scalar_lea.hbm %s698_s1, %s278_s19  ;;  %s391_s2 = scalar_lea.vmem %s640_s18, 64 }
  0x42   : > { %v154_v3 = vrot.slane %v153_v2, 4  ;;  %p392_p8 = scmp.ne.s32.totalorder %s640_s18, %s391_s2  ;;  %p707_p9 = scmp.ne.s32.totalorder %s702_s22, 0 }
  0x43   : > { %s492_s9 = smov [#allocation5]  }
  0x44   : > { %v155_v4 = vadd.f32 %v154_v3, %v153_v2  ;;  %p393_p12 = pnand %p392_p8, %p707_p9  ;;  %s395_s10 = sshll.u32 %s492_s9, 4  ;;  %s396_s10 = int_to_ptr.vmem [resolvable:$false] %s395_s10 }
  0x45   : > { %s397_s4 = scalar_lea.vmem %s396_s10, 128  ;;  %p398_p7 = scmp.lt.s32.totalorder %s640_s18, %s396_s10 }
  0x46   : > { %v156_v5 = vrot.slane %v155_v4, 2  ;;  %p394_p0 = pneg %p393_p12  ;;  %p399_p13 = scmp.lt.s32.totalorder %s397_s4, %s391_s2 }
  0x48   : > { %v157_v6 = vadd.f32 %v156_v5, %v155_v4  ;;  %p400_p4 = por %p399_p13, %p398_p7 }
  0x4a   : > { %v158_v7 = vrot.slane %v157_v6, 1  ;;  %p401_p6 = pnand %p400_p4, %p394_p0 }
  0x4c   : > { %v159_v8 = vadd.f32 %v158_v7, %v157_v6 }
  0x4e   : > { %v160_v9 = vmul.f32 0.25, %v159_v8 }
  0x50   : > { %v161_v10 = vadd.f32 1e-08, %v160_v9 }
  0x52   : > { %359 = vrsqrt.f32 %v161_v10 }
  0x5c   : > { %v360_v11 = vpop.eup %359 }
  0x5d   : > { %v163_v12 = vmul.f32 %v360_v11, %v150_v0 }
  0x5f   : > { %164 = vst [vmem:[%s149_s15] sm:$0xf] %v163_v12 }
  0x60   : > { %404 = shalt.err (!%p401_p6)
}
  0x61   : > { %s405_s5 = scalar_lea.hbm %s645_s30, 64  ;;  %s409_s20 = scalar_lea.hbm %s698_s1, 256 }
  0x62   : > { %p406_p3 = scmp.ne.s32.totalorder %s645_s30, %s405_s5  ;;  %p410_p1 = scmp.lt.u32.totalorder %s645_s30, %s698_s1 }
  0x63   : > { %p411_p2 = scmp.lt.u32.totalorder %s409_s20, %s405_s5  ;;  %p413_p8 = scmp.lt.u32.totalorder %s405_s5, %s645_s30 }
  0x64   : > { %p407_p10 = pnand %p406_p3, %p707_p9 }
  0x65   : > { %p412_p5 = por %p411_p2, %p410_p1 }
  0x66   : > { %p408_p11 = pneg %p407_p10 }
  0x67   : > { %p414_p12 = por %p413_p8, %p412_p5 }
  0x69   : > { %p415_p0 = pnand %p414_p12, %p408_p11 }
  0x6b   : > { %418 = shalt.err (!%p415_p0)
}
  0x6c   : > { %283 = dma.vmem_to_hbm [thread:$0]  (%p707_p9), %s640_s18, 64, %s645_s30, %s166_s26  }
  0x6d PF: > { %p294_p7 = scmp.ge.s32.totalorder %s489_s13, 2  ;;  %s193_s21 = sand.u32 1, %s461_s6  }
  0x6e   : > { %p708_p13 = scmp.ne.s32.totalorder %s703_s25, 0  ;;  %s194_s15 = scalar_lea.sflag [#allocation4], %s193_s21 }
  0x70   : > { %p290_p4 = pnand %p294_p7, %p708_p13 }
  0x72   : > { %456 = dma.done.wait (!%p290_p4), %s194_s15, 64  }
  0x73   : > { %458 = vsyncadd (!%p290_p4), %s194_s15, 4294967232  ;;  %s17_s13 = sadd.s32 1, %s489_s13   ;;  %s709_s6 = smov %s465_s7 }
  0x74   : > { %p14_p6 = scmp.ge.s32.totalorder %s17_s13, 6   ;;  %s710_s7 = smov %s469_s8 }
  0x75   : > { %s711_s8 = smov %s581_s27  ;;  %s712_s9 = smov %s481_s11 }
  0x76   : > { %s713_s10 = smov %s485_s12  ;;  %s714_s11 = smov %s717_s16 }
  0x77   : > { %s715_s12 = smov %s721_s17  ;;  %16 = sbr.rel (!%p14_p6) target bundleno = 7 (0x7), region = 69 }
  0x7e   :  { %199 = vsyncpa [#allocation3], 1 }
  0x7f   :  { %201 = vsyncpa [#allocation3 + $0x1], 1 }
  0x80   :  { %202 = vsyncpa [#allocation4], 1 }
  0x81   :  { %204 = vsyncpa [#allocation4 + $0x1], 1 }

</bundles_post_ra>
